<compile_context>
chip_gen: v7x
topology: tpu7x:2x2x1
jax: 0.10.0
libtpu: 0.0.40
codegen_flags: <defaults>
</compile_context>

<pallas_src>
import jax
import jax.numpy as jnp
from jax.experimental import pallas as pl
from jax.experimental.pallas import tpu as pltpu


_LANES = 512                 # lane-dense last dim (multiple of 128)
_MAX_ROWS_PER_TILE = 1024    # 1024 x 512 f32 = 2 MiB / array / buffer
_FAST_PATH_MAX_ELEMS = 1 << 16


def _net_forward_kernel(params_ref, n_ref, t_ref, y_ref):
    """Elementwise hot path: y = n + b1 * exp(-b2 / t) + w.

    params_ref : SMEM float32[3] -> (b1, b2, w)
    n_ref, t_ref : VMEM tiles (tm, 512) in the caller's native dtype.
    y_ref : VMEM tile (tm, 512) in the original output dtype.
    """
    b1 = params_ref[0]
    neg_b2 = -params_ref[1]          # hoist the negation once per tile
    w = params_ref[2]
    n = n_ref[...].astype(jnp.float32)
    t = t_ref[...].astype(jnp.float32)
    y = n + b1 * jnp.exp(neg_b2 / t) + w
    y_ref[...] = y.astype(y_ref.dtype)


def _pick_tile_rows(rows_padded, sub):
    """Choose the tile height (multiple of `sub`, <= _MAX_ROWS_PER_TILE)."""
    if rows_padded <= sub:
        return rows_padded                     # single minimal tile
    if rows_padded <= 2 * _MAX_ROWS_PER_TILE:
        # Split into ~2 tiles so v7x's two TensorCores both get work.
        half = rows_padded // 2
        return -(-half // sub) * sub
    return _MAX_ROWS_PER_TILE


def net_forward(params, x, n, t, train=False, force_pallas=False):
    """JAX wrapper mirroring Net.forward(x, n, t, train).

    `x` and `train` are ignored, exactly as in the PyTorch module.
    """
    del x, train  # unused by the reference forward pass

    orig_shape = n.shape
    out_dtype = n.dtype
    n_elems = n.size

    params_f32 = params.astype(jnp.float32)

    # ---- trace-time fast path for tiny inputs ------------------------------
    if n_elems < _FAST_PATH_MAX_ELEMS and not force_pallas:
        b1, b2, w = params_f32[0], params_f32[1], params_f32[2]
        y = (n.astype(jnp.float32)
             + b1 * jnp.exp(-b2 / t.astype(jnp.float32)) + w)
        return y.astype(out_dtype)

    # ---- lane-dense repack: view the flat buffer as [rows, 512] ------------
    itemsize = jnp.dtype(n.dtype).itemsize
    sub = max(8, 32 // itemsize)               # sublane multiple per packing
    rows = -(-n_elems // _LANES)
    rows_padded = -(-rows // sub) * sub        # only pad to sublane multiple
    padded_elems = rows_padded * _LANES
    pad = padded_elems - n_elems               # static at trace time

    n_flat = jnp.ravel(n)
    t_flat = jnp.ravel(t)
    if pad:
        n_flat = jnp.pad(n_flat, (0, pad))
        # Pad t with 1 (NOT 0) so -b2/t stays finite in the padded tail.
        t_flat = jnp.pad(t_flat, (0, pad), constant_values=1)
    n2 = n_flat.reshape(rows_padded, _LANES)
    t2 = t_flat.reshape(rows_padded, _LANES)

    tm = _pick_tile_rows(rows_padded, sub)
    grid = (pl.cdiv(rows_padded, tm),)

    cost = pl.CostEstimate(
        flops=5 * padded_elems,
        transcendentals=padded_elems,
        bytes_accessed=2 * padded_elems * itemsize
        + padded_elems * jnp.dtype(out_dtype).itemsize,
    )

    y2 = pl.pallas_call(
        _net_forward_kernel,
        out_shape=jax.ShapeDtypeStruct((rows_padded, _LANES), out_dtype),
        grid=grid,
        in_specs=[
            pl.BlockSpec(memory_space=pltpu.MemorySpace.SMEM),  # (b1, b2, w)
            pl.BlockSpec((tm, _LANES), lambda i: (i, 0)),       # n tile
            pl.BlockSpec((tm, _LANES), lambda i: (i, 0)),       # t tile
        ],
        out_specs=pl.BlockSpec((tm, _LANES), lambda i: (i, 0)),
        compiler_params=pltpu.CompilerParams(
            dimension_semantics=("parallel",),
        ),
        cost_estimate=cost,
    )(params_f32, n2, t2)

    y_flat = y2.reshape(-1)
    if pad:
        y_flat = y_flat[:n_elems]
    return y_flat.reshape(orig_shape)


def init_params(key):
    """Deterministic init of the parameters actually used by forward:
    b1, b2, w ~ N(0, 1), each scalar (torch.randn(1))."""
    kb1, kb2, kw = jax.random.split(key, 3)
    b1 = jax.random.normal(kb1, (1,), jnp.float32)
    b2 = jax.random.normal(kb2, (1,), jnp.float32)
    w = jax.random.normal(kw, (1,), jnp.float32)
    return jnp.concatenate([b1, b2, w]).astype(jnp.float32)
    # TODO(synk): LSTM / decoder / predict / dropout weights exist in
    # __init__ but are dead code in forward, so they are not materialized.


def _reference(params, n, t):
    b1, b2, w = params[0], params[1], params[2]
    return n + b1 * jnp.exp(-b2 / t) + w


if __name__ == "__main__":
    key = jax.random.PRNGKey(0)
    k_params, k_x, k_n, k_t, k_n2, k_t2 = jax.random.split(key, 6)

    params = init_params(k_params)                                   # f32[3]

    # --- toy shapes implied by the module: batch=2, seq=8, n_feature=4 -----
    seq_len, batch, n_feature = 8, 2, 4
    x = jax.random.normal(k_x, (seq_len, batch, n_feature), jnp.float32)
    n = jax.random.normal(k_n, (seq_len, batch), jnp.float32)
    # Keep t strictly positive (it sits in a denominator).
    t = jax.random.uniform(k_t, (seq_len, batch), jnp.float32,
                           minval=1.0, maxval=10.0)
    y_ref = _reference(params, n, t)

    # 1) Pallas kernel at the module's small shapes (forced past fast path).
    y_pallas = jax.block_until_ready(
        net_forward(params, x, n, t, train=True, force_pallas=True))
    assert y_pallas.shape == n.shape and y_pallas.dtype == jnp.float32
    assert jnp.allclose(y_pallas, y_ref, rtol=1e-5, atol=1e-5)

    # 2) Default path for small inputs (fused jnp fast path).
    y_fast = jax.block_until_ready(net_forward(params, x, n, t, train=True))
    assert jnp.allclose(y_fast, y_ref, rtol=1e-5, atol=1e-5)

    # 3) Larger run: exercises the pad-free repack + 2-tile grid path.
    seq_len2, batch2 = 1024, 160                  # 163840 elems, pad == 0
    n_big = jax.random.normal(k_n2, (seq_len2, batch2), jnp.float32)
    t_big = jax.random.uniform(k_t2, (seq_len2, batch2), jnp.float32,
                               minval=1.0, maxval=10.0)
    y_big = jax.block_until_ready(
        net_forward(params, None, n_big, t_big, train=False))
    y_big_ref = _reference(params, n_big, t_big)
    assert y_big.shape == n_big.shape and y_big.dtype == jnp.float32
    assert jnp.allclose(y_big, y_big_ref, rtol=1e-5, atol=1e-5)

    print("KERNEL_OK")
</pallas_src>

<mosaic_0001>
module attributes {stable_mosaic.version = 11 : i64} {
  func.func @_net_forward_kernel(%arg0: i32, %arg1: memref<3xf32, #tpu.memory_space<smem>>, %arg2: memref<8x512xf32, #tpu.memory_space<vmem>>, %arg3: memref<8x512xf32, #tpu.memory_space<vmem>>, %arg4: memref<8x512xf32, #tpu.memory_space<vmem>>) attributes {dimension_semantics = [#tpu.dimension_semantics<parallel>], iteration_bounds = array<i64: 1>, scalar_prefetch = 0 : i64, scratch_operands = 0 : i64, tpu.core_type = #tpu.core_type<tc>, window_params = [{transform_indices = @transform_0, window_bounds = array<i64: 3>}, {transform_indices = @transform_1, window_bounds = array<i64: 8, 512>}, {transform_indices = @transform_2, window_bounds = array<i64: 8, 512>}, {transform_indices = @transform_3, window_bounds = array<i64: 8, 512>}]} {
    %c0 = arith.constant 0 : index
    %0 = memref.load %arg1[%c0] : memref<3xf32, #tpu.memory_space<smem>>
    %c1 = arith.constant 1 : index
    %1 = memref.load %arg1[%c1] : memref<3xf32, #tpu.memory_space<smem>>
    %cst = arith.constant 0.000000e+00 : f32
    %2 = arith.subf %cst, %1 : f32
    %c2 = arith.constant 2 : index
    %3 = memref.load %arg1[%c2] : memref<3xf32, #tpu.memory_space<smem>>
    %c0_0 = arith.constant 0 : index
    %c0_1 = arith.constant 0 : index
    %4 = vector.load %arg2[%c0_0, %c0_1] : memref<8x512xf32, #tpu.memory_space<vmem>>, vector<8x512xf32>
    %c0_2 = arith.constant 0 : index
    %c0_3 = arith.constant 0 : index
    %5 = vector.load %arg3[%c0_2, %c0_3] : memref<8x512xf32, #tpu.memory_space<vmem>>, vector<8x512xf32>
    %6 = vector.broadcast %2 : f32 to vector<8x512xf32>
    %7 = arith.divf %6, %5 : vector<8x512xf32>
    %8 = math.exp %7 : vector<8x512xf32>
    %9 = vector.broadcast %0 : f32 to vector<8x512xf32>
    %10 = arith.mulf %9, %8 : vector<8x512xf32>
    %11 = arith.addf %4, %10 : vector<8x512xf32>
    %12 = vector.broadcast %3 : f32 to vector<8x512xf32>
    %13 = arith.addf %11, %12 : vector<8x512xf32>
    %c0_4 = arith.constant 0 : index
    %c0_5 = arith.constant 0 : index
    %14 = vector.load %arg4[%c0_4, %c0_5] : memref<8x512xf32, #tpu.memory_space<vmem>>, vector<8x512xf32>
    tpu.vector_store %arg4[%c0_4, %c0_5], %13 {strides = array<i32>} : memref<8x512xf32, #tpu.memory_space<vmem>>, vector<8x512xf32>,
    return
  }
  func.func @transform_0(%arg0: i32) -> i32 {
    %c0_i32 = arith.constant 0 : i32
    %c0_i32_0 = arith.constant 0 : i32
    return %c0_i32 : i32
  }
  func.func @transform_1(%arg0: i32) -> (i32, i32) {
    %c0_i32 = arith.constant 0 : i32
    %c0_i32_0 = arith.constant 0 : i32
    return %arg0, %c0_i32 : i32, i32
  }
  func.func @transform_2(%arg0: i32) -> (i32, i32) {
    %c0_i32 = arith.constant 0 : i32
    %c0_i32_0 = arith.constant 0 : i32
    return %arg0, %c0_i32 : i32, i32
  }
  func.func @transform_3(%arg0: i32) -> (i32, i32) {
    %c0_i32 = arith.constant 0 : i32
    %c0_i32_0 = arith.constant 0 : i32
    return %arg0, %c0_i32 : i32, i32
  }
}

</mosaic_0001>

<bundles_post_ra>
// kernel: tpu_custom_call.1
= control target key start
LH: loop header
LB: loop body
LE: loop exit
PB: predicated region body
PF: predicated region fallthrough
CT: control target
= control target key end

     0   :  { %8 = vsyncpa [#allocation5], 0  ;;  %s292_s0 = inlined_call_operand.hbm [shape: f32[3], index: 0, kind: input, shape index: {}]   ;;  %s293_s1 = inlined_call_operand.hbm [shape: f32[8,512], index: 1, kind: input, shape index: {}]   ;;  %s294_s2 = inlined_call_operand.hbm [shape: f32[8,512], index: 2, kind: input, shape index: {}]   ;;  %s295_s3 = inlined_call_operand.hbm [shape: f32[8,512], index: 3, kind: output, shape index: {}]  }
   0x1   :  { %9 = vsyncpa [#allocation3], 0 }
   0x2   :  { %10 = vsyncpa [#allocation8], 0 }
   0x3   :  { %11 = vsyncpa [#allocation4], 0  ;;  %s136_s14 = scalar_lea.hbm %s292_s0, 16 }
   0x4   :  { %p137_p0 = scmp.ne.s32.totalorder %s292_s0, %s136_s14  ;;  %p140_p1 = scmp.lt.u32.totalorder %s136_s14, %s292_s0 }
   0x6   :  { %p142_p2 = pnand %p140_p1, %p137_p0 }
   0x8   :  { %145 = shalt.err (!%p142_p2)
}
   0x9   :  { %s220_s19 = smov [#allocation2]   ;;  %s221_s22 = smov [#allocation6]  }
   0xa   :  { %19 = dma.hbm_to_smem %s292_s0, 16, %s220_s19, [#allocation5]  }
   0xb   :  { %s26_s23 = sshll.u32 %s221_s22, 4  ;;  %s222_s24 = smov [#allocation7]   ;;  %s27_s23 = int_to_ptr.vmem [resolvable:$true] %s26_s23 }
   0xc   :  { %s36_s25 = sshll.u32 %s222_s24, 4  ;;  %s146_s28 = scalar_lea.hbm %s293_s1, 512  ;;  %s37_s25 = int_to_ptr.vmem [resolvable:$true] %s36_s25 }
   0xd   :  { %p147_p3 = scmp.ne.s32.totalorder %s293_s1, %s146_s28  ;;  %p150_p4 = scmp.lt.u32.totalorder %s146_s28, %s293_s1 }
   0xf   :  { %p152_p5 = pnand %p150_p4, %p147_p3 }
  0x11   :  { %155 = shalt.err (!%p152_p5)
}
  0x12   :  { %s156_s0 = scalar_lea.vmem %s27_s23, 512  ;;  %p161_p7 = scmp.lt.s32.totalorder %s27_s23, %s27_s23 }
  0x13   :  { %p157_p6 = scmp.ne.s32.totalorder %s27_s23, %s156_s0  ;;  %p162_p8 = scmp.lt.s32.totalorder %s156_s0, %s156_s0 }
  0x15   :  { %p163_p9 = por %p162_p8, %p161_p7 }
  0x17   :  { %p164_p10 = pnand %p163_p9, %p157_p6 }
  0x19   :  { %167 = shalt.err (!%p164_p10)
}
  0x1a   :  { %29 = dma.hbm_to_vmem [thread:$0]  %s293_s1, 512, %s27_s23, [#allocation3]  }
  0x1b   :  { %s168_s10 = scalar_lea.hbm %s294_s2, 512 }
  0x1c   :  { %p169_p11 = scmp.ne.s32.totalorder %s294_s2, %s168_s10  ;;  %p172_p12 = scmp.lt.u32.totalorder %s168_s10, %s294_s2 }
  0x1e   :  { %p174_p13 = pnand %p172_p12, %p169_p11 }
  0x20   :  { %177 = shalt.err (!%p174_p13)
}
  0x21   :  { %s178_s15 = scalar_lea.vmem %s37_s25, 512  ;;  %p183_p1 = scmp.lt.s32.totalorder %s37_s25, %s37_s25 }
  0x22   :  { %p179_p0 = scmp.ne.s32.totalorder %s37_s25, %s178_s15  ;;  %p184_p2 = scmp.lt.s32.totalorder %s178_s15, %s178_s15 }
  0x24   :  { %p185_p3 = por %p184_p2, %p183_p1 }
  0x26   :  { %p186_p4 = pnand %p185_p3, %p179_p0 }
  0x28   :  { %189 = shalt.err (!%p186_p4)
}
  0x29   :  { %39 = dma.hbm_to_vmem [thread:$0]  %s294_s2, 512, %s37_s25, [#allocation8]  }
  0x2a   :  { %212 = dma.done.wait [#allocation5], 16  }
  0x2b   :  { %213 = vsyncadd [#allocation5], 4294967280 }
  0x2c   :  { %214 = dma.done.wait [#allocation3], 512  }
  0x2d   :  { %215 = vsyncadd [#allocation3], 4294966784 }
  0x2e   :  { %216 = dma.done.wait [#allocation8], 512  }
  0x2f   :  { %217 = vsyncadd [#allocation8], 4294966784 }
  0x30   :  { %49 = sfence }
  0x31   :  { %s114_s17 = sld [smem:[#allocation2 + $0x1]]  ;;  %v58_v0 = vld [vmem:[#allocation7] sm:$0xff]  ;;  %v59_v1 = vld [vmem:[#allocation7 + $0x8] sm:$0xff]  ;;  %v60_v2 = vld [vmem:[#allocation7 + $0x10] sm:$0xff]  ;;  %s50_s2 = sld [smem:[#allocation2]] }
  0x32   :  { %120 = vrcp.f32 %v58_v0  ;;  %v61_v3 = vld [vmem:[#allocation7 + $0x18] sm:$0xff]  ;;  %s115_s19 = sld [smem:[#allocation2 + $0x2]]  ;;  %v54_v19 = vld [vmem:[#allocation6] sm:$0xff]  ;;  %v55_v22 = vld [vmem:[#allocation6 + $0x8] sm:$0xff]  ;;  %s223_s20 = smov [#allocation9]  }
  0x33   :  { %122 = vrcp.f32 %v59_v1  ;;  %v56_v26 = vld [vmem:[#allocation6 + $0x10] sm:$0xff]  ;;  %v57_v30 = vld [vmem:[#allocation6 + $0x18] sm:$0xff]  ;;  %s103_s21 = sshll.u32 %s223_s20, 4  ;;  %s104_s21 = int_to_ptr.vmem [resolvable:$true] %s103_s21 }
  0x34   :  { %124 = vrcp.f32 %v60_v2  ;;  %s190_s22 = scalar_lea.vmem %s104_s21, 512  ;;  %p195_p6 = scmp.lt.s32.totalorder %s104_s21, %s104_s21 }
  0x35   :  { %126 = vrcp.f32 %v61_v3  ;;  %p191_p5 = scmp.ne.s32.totalorder %s104_s21, %s190_s22  ;;  %p196_p7 = scmp.lt.s32.totalorder %s190_s22, %s190_s22 }
  0x37   :  { %s52_s18 = ssub.f32 0.0, %s114_s17  ;;  %v79_v17 = vstv %s50_s2  ;;  %p197_p8 = por %p196_p7, %p195_p6 }
  0x38   :  { %v88_v24 = vstv %s115_s19 }
  0x39   :  { %v62_v4 = vstv %s52_s18  ;;  %p198_p9 = pnand %p197_p8, %p191_p5 }
  0x3c   :  { %v121_v5 = vpop.eup %120 }
  0x3d   :  { %v123_v6 = vpop.eup %122  ;;  %v64_v7 = vmul.f32 %v121_v5, %v62_v4 }
  0x3e   :  { %v125_v8 = vpop.eup %124  ;;  %v66_v9 = vmul.f32 %v123_v6, %v62_v4 }
  0x3f   :  { %v127_v10 = vpop.eup %126  ;;  %v71_v11 = vmul.f32 1.442695, %v64_v7  ;;  %v68_v12 = vmul.f32 %v125_v8, %v62_v4 }
  0x40   :  { %v73_v13 = vmul.f32 1.442695, %v66_v9  ;;  %v70_v14 = vmul.f32 %v127_v10, %v62_v4 }
  0x41   :  { %128 = vpow2.f32 %v71_v11  ;;  %v75_v15 = vmul.f32 1.442695, %v68_v12 }
  0x42   :  { %130 = vpow2.f32 %v73_v13  ;;  %v77_v16 = vmul.f32 1.442695, %v70_v14 }
  0x43   :  { %132 = vpow2.f32 %v75_v15 }
  0x44   :  { %134 = vpow2.f32 %v77_v16 }
  0x4b   :  { %v129_v18 = vpop.eup %128 }
  0x4c   :  { %v131_v20 = vpop.eup %130  ;;  %v80_v21 = vmul.f32 %v129_v18, %v79_v17 }
  0x4d   :  { %v133_v23 = vpop.eup %132  ;;  %v81_v25 = vmul.f32 %v131_v20, %v79_v17 }
  0x4e   :  { %v135_v27 = vpop.eup %134  ;;  %v84_v28 = vadd.f32 %v80_v21, %v54_v19  ;;  %v82_v29 = vmul.f32 %v133_v23, %v79_v17 }
  0x4f   :  { %v85_v31 = vadd.f32 %v81_v25, %v55_v22  ;;  %v83_v32 = vmul.f32 %v135_v27, %v79_v17 }
  0x50   :  { %v89_v33 = vadd.f32 %v88_v24, %v84_v28  ;;  %v86_v34 = vadd.f32 %v82_v29, %v56_v26 }
  0x51   :  { %v90_v35 = vadd.f32 %v88_v24, %v85_v31  ;;  %v87_v36 = vadd.f32 %v83_v32, %v57_v30 }
  0x52   :  { %93 = vst [vmem:[#allocation9] sm:$0xff] %v89_v33  ;;  %v91_v37 = vadd.f32 %v88_v24, %v86_v34 }
  0x53   :  { %94 = vst [vmem:[#allocation9 + $0x8] sm:$0xff] %v90_v35  ;;  %v92_v38 = vadd.f32 %v88_v24, %v87_v36 }
  0x54   :  { %95 = vst [vmem:[#allocation9 + $0x10] sm:$0xff] %v91_v37 }
  0x55   :  { %96 = vst [vmem:[#allocation9 + $0x18] sm:$0xff] %v92_v38 }
  0x56   :  { %201 = shalt.err (!%p198_p9)
}
  0x57   :  { %s202_s25 = scalar_lea.hbm %s295_s3, 512 }
  0x58   :  { %p203_p10 = scmp.ne.s32.totalorder %s295_s3, %s202_s25  ;;  %p206_p11 = scmp.lt.u32.totalorder %s202_s25, %s295_s3 }
  0x5a   :  { %p208_p12 = pnand %p206_p11, %p203_p10 }
  0x5c   :  { %211 = shalt.err (!%p208_p12)
}
  0x5d   :  { %106 = dma.vmem_to_hbm [thread:$0]  %s104_s21, 512, %s295_s3, [#allocation4]  }
  0x5e   :  { %218 = dma.done.wait [#allocation4], 512  }
  0x5f   :  { %219 = vsyncadd [#allocation4], 4294966784 }
  0x60   :  { %110 = vsyncpa [#allocation3], 1 }
  0x61   :  { %111 = vsyncpa [#allocation8], 1 }
  0x62   :  { %112 = vsyncpa [#allocation4], 1 }
  0x63   :  { %113 = vsyncpa [#allocation5], 1 }

</bundles_post_ra>
